<compile_context>
chip_gen: v5e
topology: v5e:2x2
jax: 0.10.0
libtpu: 0.0.40
codegen_flags: <defaults>
</compile_context>

<pallas_src>
import jax
import jax.numpy as jnp
from jax.experimental import pallas as pl
from jax.experimental.pallas import tpu as pltpu


# --------------------------------------------------------------------------
# Kernel
# --------------------------------------------------------------------------
def attention_kernel(x_ref, wt_ref, b_ref, enc_ref, o_ref,
                     q_sc, m_sc, l_sc, acc_sc):
    # x_ref:   (BB, H)       decoder states for this batch block
    # wt_ref:  (H, D2)       pre-transposed linear weight (grid-invariant)
    # b_ref:   (1, D2)       linear bias (grid-invariant)
    # enc_ref: (BB, SC, D2)  encoder chunk (native dtype, never cast to f32)
    # o_ref:   (BB, D2)      output context vectors
    # q_sc:    (BB, D2) f32  cached query (computed once per batch block)
    # m_sc:    (BB, 1)  f32  running softmax max
    # l_sc:    (BB, 1)  f32  running softmax denominator
    # acc_sc:  (BB, D2) f32  running (unnormalized) context accumulator
    si = pl.program_id(1)

    @pl.when(si == 0)
    def _():
        # q = x @ W^T + b  — one MXU matmul with BB rows in M, f32 accumulate.
        q_sc[...] = (jnp.dot(x_ref[...], wt_ref[...],
                             preferred_element_type=jnp.float32) + b_ref[...])
        m_sc[...] = jnp.full_like(m_sc, -jnp.inf)
        l_sc[...] = jnp.zeros_like(l_sc)
        acc_sc[...] = jnp.zeros_like(acc_sc)

    enc = enc_ref[...]                              # native dtype (bf16 or f32)
    q = q_sc[...].astype(enc.dtype)                 # (BB, D2)

    # scores[b, s] = sum_d q[b, d] * enc[b, s, d] — batched MXU matmul (M=1),
    # f32 accumulation, no transpose and no (BB, SC, D2) intermediate.
    scores = jnp.einsum('bqd,bsd->bqs', q[:, None, :], enc,
                        preferred_element_type=jnp.float32)[:, 0, :]  # (BB, SC)

    # Online (streaming) softmax over the S chunks.
    m_prev = m_sc[...]
    m_new = jnp.maximum(m_prev, jnp.max(scores, axis=-1, keepdims=True))
    alpha = jnp.exp(m_prev - m_new)                 # (BB, 1) rescale of old stats
    e = jnp.exp(scores - m_new)                     # (BB, SC), unnormalized

    l_sc[...] = alpha * l_sc[...] + jnp.sum(e, axis=-1, keepdims=True)

    # ctx_part[b, d] = sum_s e[b, s] * enc[b, s, d] — second batched MXU matmul.
    ctx_part = jnp.einsum('bqs,bsd->bqd', e[:, None, :].astype(enc.dtype), enc,
                          preferred_element_type=jnp.float32)[:, 0, :]  # (BB, D2)
    acc_sc[...] = alpha * acc_sc[...] + ctx_part
    m_sc[...] = m_new

    @pl.when(si == pl.num_programs(1) - 1)
    def _():
        # Deferred normalization: one (BB, D2) scale by an EUP reciprocal.
        o_ref[...] = (acc_sc[...] *
                      pl.reciprocal(l_sc[...], approx=True)).astype(o_ref.dtype)


# --------------------------------------------------------------------------
# Tiling / VMEM planning
# --------------------------------------------------------------------------
def _vmem_capacity_bytes():
    """Per-core VMEM capacity; conservative (v7x per-TC) fallback."""
    try:
        info = pltpu.get_tpu_info()
        cap = getattr(info, "vmem_capacity_bytes", None)
        if cap:
            return int(cap)
    except Exception:
        pass
    return 64 * 1024 * 1024


def _plan_tiling(B, S, H, D2, enc_isz, x_isz, out_isz, w_isz):
    """Pick (batch_block BB, s_chunk SC, vmem_limit_bytes).

    Honest accounting: double-buffered enc/x/out tiles, grid-invariant
    weight+bias (still double-buffered by the default pipeline), f32 scratch
    (q / softmax stats / context accumulator) and small in-kernel
    intermediates.  S is only chunked when a full-S tile cannot hold an 8-row
    batch block; SC is always an exact divisor of S (and a multiple of 8), so
    no padded encoder rows ever enter the online-softmax reduction.
    """
    cap = _vmem_capacity_bytes()
    budget = min(int(cap * 0.75), 96 * 1024 * 1024)

    fixed = 2 * (H * D2 * w_isz + D2 * w_isz)        # weight + bias (x2 buffers)
    slack = 2 * 1024 * 1024                          # compiler scratch headroom
    avail = max(budget - fixed - slack, 1)

    def per_row(sc):
        enc_t = 2 * sc * D2 * enc_isz                # double-buffered enc tile
        io_t = 2 * H * x_isz + 2 * D2 * out_isz      # x tile + out tile
        scr = 2 * D2 * 4 + 2 * 128 * 4               # q, acc, (m, l) scratch
        inter = 3 * sc * 4 + sc * enc_isz + 2 * D2 * 4 + D2 * enc_isz
        return enc_t + io_t + scr + inter

    def rows_for(sc):
        return avail // per_row(sc)

    sc = S
    bb = rows_for(sc)
    if bb < 8 and bb < B:
        # Chunk S: largest divisor of S that is a multiple of 8 and fits 8 rows.
        for cand in range(S - (S % 8 or 8), 7, -8):
            if S % cand == 0 and rows_for(cand) >= 8:
                sc = cand
                bb = rows_for(cand)
                break

    MAX_BB = 512                                     # keep grid steps for pipelining
    if bb >= B and B <= MAX_BB:
        bb = B                                       # full batch dim (always legal)
    else:
        bb = (min(bb, MAX_BB) // 8) * 8              # round DOWN, never over budget
        if bb == 0:
            bb = B if B < 8 else 8                   # minimal legal block fallback

    need = fixed + bb * per_row(sc) + slack
    vmem_limit = int(min(cap, max(need, 32 * 1024 * 1024)))
    return int(bb), int(sc), vmem_limit


# --------------------------------------------------------------------------
# Wrapper
# --------------------------------------------------------------------------
def attention_forward(inp, encoder_output, weight, bias):
    """inp: (B, H); encoder_output: (B, S, 2H); weight: (2H, H); bias: (2H,)."""
    B, H = inp.shape
    Be, S, D2 = encoder_output.shape
    assert Be == B and D2 == 2 * H

    w_t = jnp.transpose(weight)          # (H, D2): one-time transpose, hoisted
    b2 = bias.reshape(1, D2)

    BB, SC, vmem_limit = _plan_tiling(
        B, S, H, D2,
        encoder_output.dtype.itemsize, inp.dtype.itemsize,
        inp.dtype.itemsize, w_t.dtype.itemsize)

    grid = (pl.cdiv(B, BB), S // SC)

    # NOTE: if D2 is not a multiple of 128 in production, the output store is a
    # masked partial-lane vst; padding would require padding encoder_output's
    # feature dim in HBM (a full extra pass), so it is intentionally not done.
    out = pl.pallas_call(
        attention_kernel,
        out_shape=jax.ShapeDtypeStruct((B, D2), inp.dtype),
        grid_spec=pltpu.PrefetchScalarGridSpec(
            num_scalar_prefetch=0,
            grid=grid,
            in_specs=[
                pl.BlockSpec((BB, H), lambda i, s: (i, 0)),          # x
                pl.BlockSpec((H, D2), lambda i, s: (0, 0)),          # W^T (resident)
                pl.BlockSpec((1, D2), lambda i, s: (0, 0)),          # bias (resident)
                pl.BlockSpec((BB, SC, D2), lambda i, s: (i, s, 0)),  # encoder chunk
            ],
            out_specs=pl.BlockSpec((BB, D2), lambda i, s: (i, 0)),
            scratch_shapes=[
                pltpu.VMEM((BB, D2), jnp.float32),   # cached q
                pltpu.VMEM((BB, 1), jnp.float32),    # running max
                pltpu.VMEM((BB, 1), jnp.float32),    # running denominator
                pltpu.VMEM((BB, D2), jnp.float32),   # running context accumulator
            ]),
        compiler_params=pltpu.CompilerParams(
            dimension_semantics=("parallel", "arbitrary"),
            vmem_limit_bytes=vmem_limit),
    )(inp, w_t, b2, encoder_output)

    return out


# --------------------------------------------------------------------------
# Pure-JAX reference (mirrors the PyTorch module)
# --------------------------------------------------------------------------
def attention_reference(inp, encoder_output, weight, bias):
    q = inp @ weight.T + bias                              # (B, 2H)
    scores = jnp.einsum("bd,bsd->bs", q, encoder_output)   # (B, S)
    p = jax.nn.softmax(scores, axis=-1)
    return jnp.einsum("bs,bsd->bd", p, encoder_output)     # (B, 2H)


if __name__ == "__main__":
    B, S, H = 2, 8, 32
    D2 = 2 * H

    key = jax.random.PRNGKey(0)
    k1, k2, k3, k4 = jax.random.split(key, 4)

    inp = jax.random.normal(k1, (B, H), dtype=jnp.float32)
    encoder_output = jax.random.normal(k2, (B, S, D2), dtype=jnp.float32)
    # deterministic "Linear(hidden, 2*hidden)" parameters
    weight = jax.random.normal(k3, (D2, H), dtype=jnp.float32) * 0.1
    bias = jax.random.normal(k4, (D2,), dtype=jnp.float32) * 0.1

    out = jax.block_until_ready(attention_forward(inp, encoder_output, weight, bias))
    ref = attention_reference(inp, encoder_output, weight, bias)

    assert out.shape == (B, D2)
    # tolerance loosened slightly for the EUP approximate reciprocal in softmax
    assert jnp.allclose(out, ref, atol=5e-3, rtol=5e-3), "mismatch vs reference"

    print("KERNEL_OK")
</pallas_src>

<mosaic_0001>
module attributes {stable_mosaic.version = 11 : i64} {
  func.func @attention_kernel(%arg0: i32, %arg1: i32, %arg2: memref<2x32xf32, #tpu.memory_space<vmem>>, %arg3: memref<32x64xf32, #tpu.memory_space<vmem>>, %arg4: memref<1x64xf32, #tpu.memory_space<vmem>>, %arg5: memref<2x8x64xf32, #tpu.memory_space<vmem>>, %arg6: memref<2x64xf32, #tpu.memory_space<vmem>>, %arg7: memref<2x64xf32, #tpu.memory_space<vmem>>, %arg8: memref<2x1xf32, #tpu.memory_space<vmem>>, %arg9: memref<2x1xf32, #tpu.memory_space<vmem>>, %arg10: memref<2x64xf32, #tpu.memory_space<vmem>>) attributes {dimension_semantics = [#tpu.dimension_semantics<parallel>, #tpu.dimension_semantics<arbitrary>], iteration_bounds = array<i64: 1, 1>, scalar_prefetch = 0 : i64, scratch_operands = 4 : i64, tpu.core_type = #tpu.core_type<tc>, window_params = [{transform_indices = @transform_0, window_bounds = array<i64: 2, 32>}, {pipeline_mode = #tpu.pipeline_mode<synchronous>, transform_indices = @transform_1, window_bounds = array<i64: 32, 64>}, {pipeline_mode = #tpu.pipeline_mode<synchronous>, transform_indices = @transform_2, window_bounds = array<i64: 1, 64>}, {transform_indices = @transform_3, window_bounds = array<i64: 2, 8, 64>}, {transform_indices = @transform_4, window_bounds = array<i64: 2, 64>}]} {
    %c0_i32 = arith.constant 0 : i32
    %0 = arith.cmpi eq, %arg1, %c0_i32 : i32
    %1 = arith.extui %0 : i1 to i32
    %c0_i32_0 = arith.constant 0 : i32
    %2 = arith.cmpi ne, %1, %c0_i32_0 : i32
    scf.if %2 {
      %c0_22 = arith.constant 0 : index
      %c0_23 = arith.constant 0 : index
      %35 = vector.load %arg2[%c0_22, %c0_23] : memref<2x32xf32, #tpu.memory_space<vmem>>, vector<2x32xf32>
      %c0_24 = arith.constant 0 : index
      %c0_25 = arith.constant 0 : index
      %36 = vector.load %arg3[%c0_24, %c0_25] : memref<32x64xf32, #tpu.memory_space<vmem>>, vector<32x64xf32>
      %cst_26 = arith.constant dense<0.000000e+00> : vector<2x64xf32>
      %37 = tpu.matmul %35, %36, %cst_26 {dimension_numbers = #tpu.dot_dimension_numbers<[1], [0], [0], [1], [0, 0, 1, 1], [], []>} : vector<2x32xf32>, vector<32x64xf32>, vector<2x64xf32> -> vector<2x64xf32>
      %c0_27 = arith.constant 0 : index
      %c0_28 = arith.constant 0 : index
      %38 = vector.load %arg4[%c0_27, %c0_28] : memref<1x64xf32, #tpu.memory_space<vmem>>, vector<1x64xf32>
      %39 = vector.broadcast %38 : vector<1x64xf32> to vector<2x64xf32>
      %40 = arith.addf %37, %39 : vector<2x64xf32>
      %c0_29 = arith.constant 0 : index
      %c0_30 = arith.constant 0 : index
      %41 = vector.load %arg7[%c0_29, %c0_30] : memref<2x64xf32, #tpu.memory_space<vmem>>, vector<2x64xf32>
      tpu.vector_store %arg7[%c0_29, %c0_30], %40 {strides = array<i32>} : memref<2x64xf32, #tpu.memory_space<vmem>>, vector<2x64xf32>,
      %cst_31 = arith.constant 0xFF800000 : f32
      %42 = vector.broadcast %cst_31 : f32 to vector<2x1xf32>
      %c0_32 = arith.constant 0 : index
      %c0_33 = arith.constant 0 : index
      %43 = vector.load %arg8[%c0_32, %c0_33] : memref<2x1xf32, #tpu.memory_space<vmem>>, vector<2x1xf32>
      tpu.vector_store %arg8[%c0_32, %c0_33], %42 {strides = array<i32>} : memref<2x1xf32, #tpu.memory_space<vmem>>, vector<2x1xf32>,
      %cst_34 = arith.constant 0.000000e+00 : f32
      %44 = vector.broadcast %cst_34 : f32 to vector<2x1xf32>
      %c0_35 = arith.constant 0 : index
      %c0_36 = arith.constant 0 : index
      %45 = vector.load %arg9[%c0_35, %c0_36] : memref<2x1xf32, #tpu.memory_space<vmem>>, vector<2x1xf32>
      tpu.vector_store %arg9[%c0_35, %c0_36], %44 {strides = array<i32>} : memref<2x1xf32, #tpu.memory_space<vmem>>, vector<2x1xf32>,
      %cst_37 = arith.constant 0.000000e+00 : f32
      %46 = vector.broadcast %cst_37 : f32 to vector<2x64xf32>
      %c0_38 = arith.constant 0 : index
      %c0_39 = arith.constant 0 : index
      %47 = vector.load %arg10[%c0_38, %c0_39] : memref<2x64xf32, #tpu.memory_space<vmem>>, vector<2x64xf32>
      tpu.vector_store %arg10[%c0_38, %c0_39], %46 {strides = array<i32>} : memref<2x64xf32, #tpu.memory_space<vmem>>, vector<2x64xf32>,
    } else {
    }
    %c0 = arith.constant 0 : index
    %c0_1 = arith.constant 0 : index
    %c0_2 = arith.constant 0 : index
    %3 = vector.load %arg5[%c0, %c0_1, %c0_2] : memref<2x8x64xf32, #tpu.memory_space<vmem>>, vector<2x8x64xf32>
    %c0_3 = arith.constant 0 : index
    %c0_4 = arith.constant 0 : index
    %4 = vector.load %arg7[%c0_3, %c0_4] : memref<2x64xf32, #tpu.memory_space<vmem>>, vector<2x64xf32>
    %5 = vector.shape_cast %4 : vector<2x64xf32> to vector<2x1x64xf32>
    "tpu.trace_start"() <{level = 10 : i32, message = "bqd,bsd->bqs"}> : () -> ()
    %cst = arith.constant dense<0.000000e+00> : vector<2x1x8xf32>
    %6 = tpu.matmul %5, %3, %cst {dimension_numbers = #tpu.dot_dimension_numbers<[2], [2], [1], [1], [0, 0, 0, 1, 1, 1], [0], [0]>} : vector<2x1x64xf32>, vector<2x8x64xf32>, vector<2x1x8xf32> -> vector<2x1x8xf32>
    "tpu.trace_stop"() : () -> ()
    %7 = vector.shape_cast %6 : vector<2x1x8xf32> to vector<2x8xf32>
    %c0_5 = arith.constant 0 : index
    %c0_6 = arith.constant 0 : index
    %8 = vector.load %arg8[%c0_5, %c0_6] : memref<2x1xf32, #tpu.memory_space<vmem>>, vector<2x1xf32>
    %cst_7 = arith.constant dense<0xFF800000> : vector<2xf32>
    %9 = vector.multi_reduction <maximumf>, %7, %cst_7 [1] : vector<2x8xf32> to vector<2xf32>
    %10 = vector.shape_cast %9 : vector<2xf32> to vector<2x1xf32>
    %11 = arith.maximumf %8, %10 : vector<2x1xf32>
    %12 = arith.subf %8, %11 : vector<2x1xf32>
    %13 = math.exp %12 : vector<2x1xf32>
    %14 = vector.broadcast %11 : vector<2x1xf32> to vector<2x8xf32>
    %15 = arith.subf %7, %14 : vector<2x8xf32>
    %16 = math.exp %15 : vector<2x8xf32>
    %c0_8 = arith.constant 0 : index
    %c0_9 = arith.constant 0 : index
    %17 = vector.load %arg9[%c0_8, %c0_9] : memref<2x1xf32, #tpu.memory_space<vmem>>, vector<2x1xf32>
    %18 = arith.mulf %13, %17 : vector<2x1xf32>
    %cst_10 = arith.constant dense<0.000000e+00> : vector<2xf32>
    %19 = vector.multi_reduction <add>, %16, %cst_10 [1] : vector<2x8xf32> to vector<2xf32>
    %20 = vector.shape_cast %19 : vector<2xf32> to vector<2x1xf32>
    %21 = arith.addf %18, %20 : vector<2x1xf32>
    %c0_11 = arith.constant 0 : index
    %c0_12 = arith.constant 0 : index
    %22 = vector.load %arg9[%c0_11, %c0_12] : memref<2x1xf32, #tpu.memory_space<vmem>>, vector<2x1xf32>
    tpu.vector_store %arg9[%c0_11, %c0_12], %21 {strides = array<i32>} : memref<2x1xf32, #tpu.memory_space<vmem>>, vector<2x1xf32>,
    %23 = vector.shape_cast %16 : vector<2x8xf32> to vector<2x1x8xf32>
    "tpu.trace_start"() <{level = 10 : i32, message = "bqs,bsd->bqd"}> : () -> ()
    %cst_13 = arith.constant dense<0.000000e+00> : vector<2x1x64xf32>
    %24 = tpu.matmul %23, %3, %cst_13 {dimension_numbers = #tpu.dot_dimension_numbers<[2], [1], [1], [2], [0, 0, 0, 1, 1, 2], [0], [0]>} : vector<2x1x8xf32>, vector<2x8x64xf32>, vector<2x1x64xf32> -> vector<2x1x64xf32>
    "tpu.trace_stop"() : () -> ()
    %25 = vector.shape_cast %24 : vector<2x1x64xf32> to vector<2x64xf32>
    %c0_14 = arith.constant 0 : index
    %c0_15 = arith.constant 0 : index
    %26 = vector.load %arg10[%c0_14, %c0_15] : memref<2x64xf32, #tpu.memory_space<vmem>>, vector<2x64xf32>
    %27 = vector.broadcast %13 : vector<2x1xf32> to vector<2x64xf32>
    %28 = arith.mulf %27, %26 : vector<2x64xf32>
    %29 = arith.addf %28, %25 : vector<2x64xf32>
    %c0_16 = arith.constant 0 : index
    %c0_17 = arith.constant 0 : index
    %30 = vector.load %arg10[%c0_16, %c0_17] : memref<2x64xf32, #tpu.memory_space<vmem>>, vector<2x64xf32>
    tpu.vector_store %arg10[%c0_16, %c0_17], %29 {strides = array<i32>} : memref<2x64xf32, #tpu.memory_space<vmem>>, vector<2x64xf32>,
    %c0_18 = arith.constant 0 : index
    %c0_19 = arith.constant 0 : index
    %31 = vector.load %arg8[%c0_18, %c0_19] : memref<2x1xf32, #tpu.memory_space<vmem>>, vector<2x1xf32>
    tpu.vector_store %arg8[%c0_18, %c0_19], %11 {strides = array<i32>} : memref<2x1xf32, #tpu.memory_space<vmem>>, vector<2x1xf32>,
    %c0_i32_20 = arith.constant 0 : i32
    %32 = arith.cmpi eq, %arg1, %c0_i32_20 : i32
    %33 = arith.extui %32 : i1 to i32
    %c0_i32_21 = arith.constant 0 : i32
    %34 = arith.cmpi ne, %33, %c0_i32_21 : i32
    scf.if %34 {
      %c0_22 = arith.constant 0 : index
      %c0_23 = arith.constant 0 : index
      %35 = vector.load %arg10[%c0_22, %c0_23] : memref<2x64xf32, #tpu.memory_space<vmem>>, vector<2x64xf32>
      %c0_24 = arith.constant 0 : index
      %c0_25 = arith.constant 0 : index
      %36 = vector.load %arg9[%c0_24, %c0_25] : memref<2x1xf32, #tpu.memory_space<vmem>>, vector<2x1xf32>
      %37 = tpu.reciprocal %36 {approx = true} : vector<2x1xf32> -> vector<2x1xf32>
      %38 = vector.broadcast %37 : vector<2x1xf32> to vector<2x64xf32>
      %39 = arith.mulf %35, %38 : vector<2x64xf32>
      %c0_26 = arith.constant 0 : index
      %c0_27 = arith.constant 0 : index
      %40 = vector.load %arg6[%c0_26, %c0_27] : memref<2x64xf32, #tpu.memory_space<vmem>>, vector<2x64xf32>
      tpu.vector_store %arg6[%c0_26, %c0_27], %39 {strides = array<i32>} : memref<2x64xf32, #tpu.memory_space<vmem>>, vector<2x64xf32>,
    } else {
    }
    return
  }
  func.func @transform_0(%arg0: i32, %arg1: i32) -> (i32, i32) {
    %c0_i32 = arith.constant 0 : i32
    %c0_i32_0 = arith.constant 0 : i32
    return %arg0, %c0_i32 : i32, i32
  }
  func.func @transform_1(%arg0: i32, %arg1: i32) -> (i32, i32) {
    %c0_i32 = arith.constant 0 : i32
    %c0_i32_0 = arith.constant 0 : i32
    %c0_i32_1 = arith.constant 0 : i32
    return %c0_i32, %c0_i32_0 : i32, i32
  }
  func.func @transform_2(%arg0: i32, %arg1: i32) -> (i32, i32) {
    %c0_i32 = arith.constant 0 : i32
    %c0_i32_0 = arith.constant 0 : i32
    %c0_i32_1 = arith.constant 0 : i32
    return %c0_i32, %c0_i32_0 : i32, i32
  }
  func.func @transform_3(%arg0: i32, %arg1: i32) -> (i32, i32, i32) {
    %c0_i32 = arith.constant 0 : i32
    %c0_i32_0 = arith.constant 0 : i32
    return %arg0, %arg1, %c0_i32 : i32, i32, i32
  }
  func.func @transform_4(%arg0: i32, %arg1: i32) -> (i32, i32) {
    %c0_i32 = arith.constant 0 : i32
    %c0_i32_0 = arith.constant 0 : i32
    return %arg0, %c0_i32 : i32, i32
  }
}

</mosaic_0001>

<bundles_post_ra>
// kernel: tpu_custom_call.1
= control target key start
LH: loop header
LB: loop body
LE: loop exit
PB: predicated region body
PF: predicated region fallthrough
CT: control target
= control target key end

     0   :  { %9 = vsyncpa [#allocation7], 0  ;;  %s487_s0 = inlined_call_operand.hbm [shape: f32[2,32], index: 0, kind: input, shape index: {}]   ;;  %s488_s1 = inlined_call_operand.hbm [shape: f32[32,64], index: 1, kind: input, shape index: {}]   ;;  %s489_s2 = inlined_call_operand.vmem [shape: f32[1,64], index: 2, kind: input, shape index: {}]   ;;  %s490_s3 = inlined_call_operand.hbm [shape: f32[2,8,64], index: 3, kind: input, shape index: {}]   ;;  %s491_s4 = inlined_call_operand.hbm [shape: f32[2,64], index: 4, kind: output, shape index: {}]  }
   0x1   :  { %10 = vsyncpa [#allocation10], 0  ;;  %s27_s17 = sshll.u32 %s488_s1, 4  ;;  %s28_s17 = int_to_ptr.hbm [resolvable:$true] %s27_s17 }
   0x2   :  { %11 = vsyncpa [#allocation8], 0  ;;  %s425_s18 = smov [#allocation9]   ;;  %s17_s22 = sshll.u32 %s487_s0, 4  ;;  %s18_s22 = int_to_ptr.hbm [resolvable:$true] %s17_s22 }
   0x3   :  { %s29_s19 = sshll.u32 %s425_s18, 4  ;;  %s426_s23 = smov 128   ;;  %s30_s19 = int_to_ptr.vmem [resolvable:$true] %s29_s19 }
   0x4   :  { %s427_s24 = smov 8   ;;  %s428_s25 = smov [#allocation6]  }
   0x5   :  { %35 = dma.hbm_to_vmem [thread:$0]  %s28_s17, 512, %s30_s19, [#allocation10], %s426_s23, %s426_s23, %s427_s24  }
   0x6   :  { %s19_s26 = sshll.u32 %s428_s25, 4  ;;  %s42_s29 = sshll.u32 %s490_s3, 4  ;;  %s20_s26 = int_to_ptr.vmem [resolvable:$true] %s19_s26  ;;  %s43_s29 = int_to_ptr.hbm [resolvable:$true] %s42_s29 }
   0x7   :  { %22 = dma.hbm_to_vmem [thread:$0]  %s18_s22, 32, %s20_s26, [#allocation7]  }
   0x8   :  { %s429_s1 = smov [#allocation11]  }
   0x9   :  { %s44_s30 = sshll.u32 %s429_s1, 4  ;;  %s45_s30 = int_to_ptr.vmem [resolvable:$true] %s44_s30 }
   0xa   :  { %50 = dma.hbm_to_vmem [thread:$0]  %s43_s29, 256, %s45_s30, [#allocation10], %s426_s23, %s426_s23, %s427_s24  }
   0xb   :  { %419 = dma.done.wait [#allocation7], 32  }
   0xc   :  { %420 = vsyncadd [#allocation7], 4294967264 }
   0xd   :  { %421 = dma.done.wait [#allocation10], 768  }
   0xe   :  { %422 = vsyncadd [#allocation10], 4294966528  ;;  %v71_v0 = vld [vmem:[#allocation9 + $0x18] sm:$0xff]  ;;  %v70_v1 = vld [vmem:[#allocation9 + $0x10] sm:$0xff]  ;;  %vm76_vm0 = vcmask 261120   ;;  %vm100_vm1 = vcmask 517120  }
   0xf   :  { %92 = vmatpush.msra.mxu0 %v71_v0  ;;  %v69_v2 = vld [vmem:[#allocation9 + $0x8] sm:$0xff]  ;;  %v68_v3 = vld [vmem:[#allocation9] sm:$0xff]  ;;  %v67_v4 = vld [vmem:[#allocation6] sm:$0x3]  ;;  %vm111_vm2 = vcmask 523264   ;;  %v430_v7 = vmov 0.0  }
  0x10   :  { %v106_v5 = vld [vmem:[#allocation11] sm:$0xff]  ;;  %v107_v6 = vld [vmem:[#allocation11 + $0x8] sm:$0xff]  ;;  %105 = vst.msk [vmem:[#allocation5] sm:$0x3] %vm100_vm1, %v430_v7  ;;  %v314_v8 = vld [vmem:[%s489_s2] ss:$0 sm:$0xff] }
  0x11   :  { %93 = vmatpush.msra.mxu0 %v70_v1  ;;  %296 = vmatpush.xpose.msk.msra.mxu1 %vm111_vm2, %v106_v5  ;;  %vm102_vm3 = vcmask 1024   ;;  %v431_v13 = vmov -inf   ;;  %vm166_vm4 = vcmask 1041409   ;;  %vm169_vm5 = vcmask 58368   ;;  %s433_s2 = smov [#allocation12]   ;;  %s284_s8 = sshll.u32 %s491_s4, 4  ;;  %s285_s8 = int_to_ptr.hbm [resolvable:$true] %s284_s8 }
  0x12   :  { %298 = vmatpush.xpose.msk.msra.mxu2 %vm111_vm2, %v107_v6  ;;  %221 = vmatpush.msra.mxu3 %v106_v5  ;;  %103 = vst.msk [vmem:[#allocation3] sm:$0x3] %vm102_vm3, %v431_v13  ;;  %v432_v19 = vmov 0   ;;  %vm203_vm6 = vcmask 64512   ;;  %s282_s5 = sshll.u32 %s433_s2, 4  ;;  %s283_s5 = int_to_ptr.vmem [resolvable:$true] %s282_s5 }
  0x13   :  { %94 = vmatpush.msra.mxu0 %v69_v2  ;;  %104 = vst.msk [vmem:[#allocation4] sm:$0x3] %vm102_vm3, %v430_v7  ;;  %311 = vset.pattern.permute.xlu0 %v432_v19 }
  0x14   :  { %243 = vmatpush.msrb.mxu3 %v107_v6  ;;  %312 = vset.pattern.permute.xlu1 %v432_v19 }
  0x15   :  { %95 = vmatpush.msra.mxu0 %v68_v3  ;;  %313 = vset.pattern.permute.xlu2 %v432_v19 }
  0x16   :  { %295 = vmatmul.msk.f32.vlgmr.msra.gmra.mxu0 %vm76_vm0, %v67_v4 }
  0x17   :  { %v248_v46 = vld [vmem:[#allocation5] sm:$0x3] }
  0x19   :  { %v162_v20 = vld [vmem:[#allocation3] sm:$0x3] }
  0x1a   :  { %v190_v37 = vld [vmem:[#allocation4] sm:$0x3] }
  0x93   :  { %v97_v9 = vpop.f32.mrf.mxu0 }
  0x94   :  { %v98_v10 = vadd.f32 %v314_v8, %v97_v9 }
  0x96   :  { %101 = vst.msk [vmem:[#allocation2] sm:$0x3] %vm100_vm1, %v98_v10 }
  0x9d   :  { %v108_v11 = vld [vmem:[#allocation2] sm:$0x3] }
  0x9e   :  { %v110_v12 = vrot.slane %v108_v11, 1  ;;  %297 = vmatmul.msk.f32.vlgmr.msra.gmra.mxu1 %vm111_vm2, %v108_v11 }
  0xa0   :  { %299 = vmatmul.msk.f32.vlgmr.msra.gmra.mxu2 %vm111_vm2, %v110_v12 }
 0x11b   :  { %v134_v16 = vpop.f32.mrf.mxu1 }
 0x123   :  { %v159_v14 = vpop.f32.mrf.mxu2 }
 0x124   :  { %v165_v15 = vrot.slane %v159_v14, 7 }
 0x126   :  { %v167_v17 = vsel %vm166_vm4, %v165_v15, %v134_v16 }
 0x127   :  { %v170_v18 = vsel %vm169_vm5, %v167_v17, -inf }
 0x128   :  { %171 = vmax.xlane.f32.xlu0 %v170_v18 }
 0x19b   :  { %v172_v21 = vpop.xlane.xlu0 %171 }
 0x19c   :  { %v173_v22 = vmax.f32 %v162_v20, %v172_v21 }
 0x19e   :  { %v174_v23 = vsub.f32 %v162_v20, %v173_v22  ;;  %263 = vst.msk [vmem:[#allocation3] sm:$0x3] %vm102_vm3, %v173_v22  ;;  %179 = vperm.xlu0 %311, %v173_v22  }
 0x1a0   :  { %v175_v35 = vmul.f32 1.442695, %v174_v23 }
 0x210   :  { %v180_v24 = vpop.permute.xlu0 %179 }
 0x211   :  { %v181_v25 = vrot.slane %v180_v24, 1  ;;  %v184_v26 = vsub.f32 %v134_v16, %v180_v24 }
 0x213   :  { %v185_v27 = vsub.f32 %v159_v14, %v181_v25  ;;  %v186_v28 = vmul.f32 1.442695, %v184_v26 }
 0x215   :  { %315 = vpow2.f32 %v186_v28  ;;  %v188_v29 = vmul.f32 1.442695, %v185_v27 }
 0x217   :  { %317 = vpow2.f32 %v188_v29 }
 0x218   :  { %319 = vpow2.f32 %v175_v35 }
 0x21b   :  { %v316_v30 = vpop.eup %315 }
 0x21c   :  { %300 = vmatmul.msk.f32.vlgmr.msra.gmra.mxu3 %vm203_vm6, %v316_v30 }
 0x21d   :  { %v318_v31 = vpop.eup %317 }
 0x21e   :  { %v194_v32 = vrot.slane %v318_v31, 7  ;;  %v320_v36 = vpop.eup %319 }
 0x21f   :  { %v191_v38 = vmul.f32 %v320_v36, %v190_v37 }
 0x220   :  { %v195_v33 = vsel %vm166_vm4, %v194_v32, %v316_v30 }
 0x221   :  { %v197_v34 = vsel %vm169_vm5, %v195_v33, 0.0 }
 0x222   :  { %198 = vadd.xlane.f32.xlu1 %v197_v34 }
 0x224   :  { %301 = vmatmul.msk.f32.vlgmr.msrb.gmra.mxu3 %vm203_vm6, %v318_v31 }
 0x23b   :  { %251 = vperm.xlu1 %312, %v320_v36  }
 0x295   :  { %v199_v39 = vpop.xlane.xlu1 %198 }
 0x296   :  { %v200_v40 = vadd.f32 %v199_v39, %v191_v38 }
 0x298   :  { %202 = vst.msk [vmem:[#allocation4] sm:$0x3] %vm102_vm3, %v200_v40 }
 0x29f   :  { %v223_v41 = vpop.f32.mrf.mxu3  ;;  %v268_v42 = vld [vmem:[#allocation4] sm:$0x3] }
 0x2a0   :  { %321 = vrcp.f32 %v268_v42 }
 0x2a6   :  { %v322_v43 = vpop.eup %321 }
 0x2a7   :  { %272 = vperm.xlu2 %313, %v322_v43   ;;  %v245_v44 = vpop.f32.mrf.mxu3 }
 0x2a8   :  { %v257_v45 = vrot.slane %v245_v44, 7 }
 0x2aa   :  { %v258_v49 = vsel %vm166_vm4, %v257_v45, %v223_v41 }
 0x2ad   :  { %v252_v47 = vpop.permute.xlu1 %251 }
 0x2ae   :  { %v254_v48 = vmul.f32 %v252_v47, %v248_v46 }
 0x2b0   :  { %v260_v50 = vadd.f32 %v258_v49, %v254_v48 }
 0x2b2   :  { %262 = vst.msk [vmem:[#allocation5] sm:$0x3] %vm100_vm1, %v260_v50 }
 0x2b9   :  { %v267_v51 = vld [vmem:[#allocation5] sm:$0x3] }
 0x301   :  { %v273_v52 = vpop.permute.xlu2 %272 }
 0x302   :  { %v275_v53 = vmul.f32 %v273_v52, %v267_v51 }
 0x304   :  { %276 = vst.msk [vmem:[#allocation12] sm:$0x3] %vm100_vm1, %v275_v53 }
 0x305   :  { %287 = dma.vmem_to_hbm [thread:$0]  %s283_s5, 32, %s285_s8, [#allocation8]  }
 0x306   :  { %423 = dma.done.wait [#allocation8], 32  }
 0x307   :  { %424 = vsyncadd [#allocation8], 4294967264 }
 0x308   :  { %292 = vsyncpa [#allocation7], 1 }
 0x309   :  { %293 = vsyncpa [#allocation10], 1 }
 0x30a   :  { %294 = vsyncpa [#allocation8], 1 }

</bundles_post_ra>
